<compile_context>
chip_gen: v5e
topology: v5e:2x2
jax: 0.10.0
libtpu: 0.0.40
codegen_flags: <defaults>
</compile_context>

<pallas_src>
import functools

import jax
import jax.numpy as jnp
from jax.experimental import pallas as pl
from jax.experimental.pallas import tpu as pltpu


# ----------------------------------------------------------------------------
# Scalar path: exact equivalent of SelfTaskGoalReward.forward (one score in,
# shape-(1,) reward out).  Single SMEM input, constant baked in.
# ----------------------------------------------------------------------------
def _reward_scalar_kernel(score_ref, out_ref, *, target_reward: float):
    # score_ref / out_ref: SMEM, shape (1,), float32.
    out_ref[0] = score_ref[0] * target_reward


def self_task_goal_reward(task_completion_score, target_reward: float = 10.0):
    """Pallas equivalent of SelfTaskGoalReward.forward.

    Args:
      task_completion_score: python float or 0-d/1-element array in [0, 1].
      target_reward: R_{self-task}^{target} (compile-time constant).

    Returns:
      jnp.ndarray of shape (1,), dtype float32.
    """
    score = jnp.asarray(task_completion_score, dtype=jnp.float32).reshape((1,))
    kernel = functools.partial(
        _reward_scalar_kernel, target_reward=float(target_reward)
    )
    return pl.pallas_call(
        kernel,
        out_shape=jax.ShapeDtypeStruct((1,), jnp.float32),
        in_specs=[pl.BlockSpec(memory_space=pltpu.SMEM)],
        out_specs=pl.BlockSpec(memory_space=pltpu.SMEM),
    )(score)


# ----------------------------------------------------------------------------
# Batched path: N scores -> N rewards in one call.  Scores are padded to a
# lane-dense (rows, 128) f32 tile (rows a multiple of 8) and multiplied on the
# VPU in a single vectorized op.
# ----------------------------------------------------------------------------
_LANES = 128
_SUBLANES = 8
_TILE = _LANES * _SUBLANES  # 1024 f32 elements = one vreg


def _reward_batched_kernel(score_ref, out_ref, *, target_reward: float):
    # score_ref / out_ref: VMEM, shape (rows, 128), float32.
    out_ref[...] = score_ref[...] * target_reward


def self_task_goal_reward_batched(task_completion_scores,
                                  target_reward: float = 10.0):
    """Batched rewards: one pallas_call for N scores.

    Args:
      task_completion_scores: array-like of shape (N,), values in [0, 1].
      target_reward: R_{self-task}^{target} (compile-time constant).

    Returns:
      jnp.ndarray of shape (N,), dtype float32.
    """
    scores = jnp.asarray(task_completion_scores, dtype=jnp.float32).reshape((-1,))
    n = scores.shape[0]
    n_pad = ((n + _TILE - 1) // _TILE) * _TILE  # multiple of 8*128
    rows = n_pad // _LANES                      # multiple of 8 by construction
    scores_2d = jnp.zeros((n_pad,), dtype=jnp.float32).at[:n].set(scores)
    scores_2d = scores_2d.reshape((rows, _LANES))

    kernel = functools.partial(
        _reward_batched_kernel, target_reward=float(target_reward)
    )
    out_2d = pl.pallas_call(
        kernel,
        out_shape=jax.ShapeDtypeStruct((rows, _LANES), jnp.float32),
        in_specs=[pl.BlockSpec(memory_space=pltpu.VMEM)],
        out_specs=pl.BlockSpec(memory_space=pltpu.VMEM),
    )(scores_2d)
    return out_2d.reshape((n_pad,))[:n]


if __name__ == "__main__":
    key = jax.random.PRNGKey(0)
    k_scalar, k_batch = jax.random.split(key)

    target_reward = 10.0

    # --- scalar path (exact module semantics) ---
    task_completion_score = jax.random.uniform(k_scalar, (), dtype=jnp.float32)
    reward = self_task_goal_reward(task_completion_score, target_reward)
    reward = jax.block_until_ready(reward)

    expected = jnp.asarray(
        [target_reward * task_completion_score], dtype=jnp.float32
    )
    assert reward.shape == (1,)
    assert jnp.allclose(reward, expected, rtol=1e-6, atol=1e-6)

    # --- batched path (hot-loop variant) ---
    scores = jax.random.uniform(k_batch, (8,), dtype=jnp.float32)
    rewards = self_task_goal_reward_batched(scores, target_reward)
    rewards = jax.block_until_ready(rewards)

    expected_b = (target_reward * scores).astype(jnp.float32)
    assert rewards.shape == (8,)
    assert jnp.allclose(rewards, expected_b, rtol=1e-6, atol=1e-6)

    print("KERNEL_OK")
</pallas_src>

<mosaic_0001>
module attributes {stable_mosaic.version = 11 : i64} {
  func.func @_reward_scalar_kernel(%arg0: memref<1xf32, #tpu.memory_space<smem>>, %arg1: memref<1xf32, #tpu.memory_space<smem>>) attributes {dimension_semantics = [], scalar_prefetch = 0 : i64, scratch_operands = 0 : i64, tpu.core_type = #tpu.core_type<tc>} {
    %c0 = arith.constant 0 : index
    %0 = memref.load %arg0[%c0] : memref<1xf32, #tpu.memory_space<smem>>
    %cst = arith.constant 1.000000e+01 : f32
    %1 = arith.mulf %0, %cst : f32
    %c0_0 = arith.constant 0 : index
    %2 = memref.load %arg1[%c0_0] : memref<1xf32, #tpu.memory_space<smem>>
    memref.store %1, %arg1[%c0_0] : memref<1xf32, #tpu.memory_space<smem>>
    return
  }
}

</mosaic_0001>

<bundles_post_ra>
// kernel: tpu_custom_call.1
= control target key start
LH: loop header
LB: loop body
LE: loop exit
PB: predicated region body
PF: predicated region fallthrough
CT: control target
= control target key end

     0   :  { %7 = vsyncpa [#allocation4], 0  ;;  %s44_s12 = smov [#allocation3]   ;;  %s61_s0 = inlined_call_operand.<no memory space> [shape: f32[1], index: 0, kind: input, shape index: {}]   ;;  %s62_s1 = inlined_call_operand.hbm [shape: f32[1], index: 1, kind: output, shape index: {}]  }
   0x1   :  { %s11_s8 = smul.f32 10.0, %s61_s0  ;;  %s19_s11 = sshll.u32 %s62_s1, 4  ;;  %s20_s11 = int_to_ptr.hbm [resolvable:$true] %s19_s11 }
   0x3   :  { %13 = sst [smem:[#allocation3]] %s11_s8 }
   0x4   :  { %22 = dma.smem_to_hbm %s44_s12, 16, %s20_s11, [#allocation4]  }
   0x5   :  { %42 = dma.done.wait [#allocation4], 16  }
   0x6   :  { %43 = vsyncadd [#allocation4], 4294967280 }
   0x7   :  { %27 = sfence }
   0x8   :  { %28 = vsyncpa [#allocation4], 1 }

</bundles_post_ra>
